<compile_context>
chip_gen: v7x
topology: tpu7x:2x2x1
jax: 0.10.0
libtpu: 0.0.40
codegen_flags: <defaults>
</compile_context>

<pallas_src>
import functools

import jax
import jax.numpy as jnp
import numpy as np
from jax import lax
from jax.experimental import pallas as pl
from jax.experimental.pallas import tpu as pltpu


def _vq_lookup_kernel(z_ref, cbn_ref, idx_ref):
    """Nearest-code lookup for one (1, D, TN) tile of z (NCHW-native layout).

    z_ref   : (1, D, TN)  latents, channels on sublanes, pixels on lanes
    cbn_ref : (E, D)      L2-normalised codebook, resident in VMEM (sim dtype)
    idx_ref : (1, 1, TN)  winning code per pixel (int32, lane-dense store)
    """
    z = z_ref[0].astype(jnp.float32)                           # (D, TN)

    # F.normalize(z, dim=1): z / max(||z||, 1e-12) == z * rsqrt(max(ss, 1e-24))
    ss = jnp.sum(z * z, axis=0, keepdims=True)                 # (1, TN)
    zn = z * lax.rsqrt(jnp.maximum(ss, 1e-24))                 # (D, TN)

    # Cosine similarity on the MXU (bf16 inputs by default -- argmax only).
    d = jnp.dot(cbn_ref[...], zn.astype(cbn_ref.dtype),
                preferred_element_type=jnp.float32)            # (E, TN)

    # Nearest code.  PyTorch (`d.sort(dim=1)`, take last) keeps the LARGEST
    # index among exact ties, so break ties towards the larger index.  The
    # reduction runs over sublanes, so idx is already lane-major (no relayout).
    iota_e = lax.broadcasted_iota(jnp.int32, d.shape, 0)       # (E, TN)
    d_max = jnp.max(d, axis=0, keepdims=True)                  # (1, TN)
    idx = jnp.max(jnp.where(d == d_max, iota_e, -1), axis=0)   # (TN,) int32
    idx_ref[...] = idx.reshape(1, 1, -1)


def _round_up(x, m):
    return ((x + m - 1) // m) * m


def _vmem_capacity_bytes():
    try:
        cap = int(pltpu.get_tpu_info().vmem_capacity_bytes)
        if cap > 0:
            return cap
    except Exception:
        pass
    return 64 * 1024 * 1024          # conservative default (v7x per-core VMEM)


def _vmem_limit_bytes():
    cap = _vmem_capacity_bytes()
    # ~96 MiB on v5e/v6e (128 MiB physical), ~48 MiB on v7x (64 MiB physical).
    return max(min(int(cap * 0.75), cap - (16 << 20)), 16 << 20)


def _choose_tile_hw(hw, batch, num_embed, embed_dim, sim_itemsize, vmem_limit):
    """Largest lane-aligned spatial tile that fits the VMEM budget.

    Accounts for the (double-buffered) resident codebook and prefers a schedule
    with >= 2 grid steps so both v7x TensorCores / the pipeline have work.
    """
    sub_e = _round_up(num_embed, 8)
    sub_d = _round_up(embed_dim, 8)
    lane_d = _round_up(embed_dim, 128)
    resident = 2 * sub_e * lane_d * sim_itemsize       # 2x: default double-buffering
    # per-lane footprint: z block (2 pipeline buffers) + zn (f32 + sim dtype)
    # + d / iota / mask temps over the codebook axis.
    per_lane = 4 * sub_d * 3 + sub_d * sim_itemsize + 4 * sub_e * 3 + 16
    budget = max(vmem_limit - resident - (4 << 20), 1 << 20)
    cap_lanes = max(128, budget // per_lane)

    cands = sorted((t for t in range(128, hw + 1, 128) if hw % t == 0),
                   reverse=True)
    if not cands:
        return hw                                       # hw < 128: full extent
    fitting = [t for t in cands if t <= cap_lanes] or [cands[-1]]
    if batch == 1:
        multi = [t for t in fitting if hw // t >= 2]
        if multi:
            return multi[0]
    return fitting[0]


@functools.partial(
    jax.jit,
    static_argnames=("beta", "tile_hw", "sim_dtype", "min_encodings_dtype"))
def vector_quantiser_forward(z_nchw, codebook, beta=0.25, tile_hw=None,
                             sim_dtype=jnp.bfloat16,
                             min_encodings_dtype=jnp.float32):
    """Forward pass of VectorQuantiser (distance='cos', eval mode).

    z_nchw   : (b, c, h, w) float32, c == embed_dim
    codebook : (num_embed, embed_dim) float32
    returns  : (z_q_nchw, loss, (perplexity, min_encodings, encoding_indices))
    """
    b, c, h, w = z_nchw.shape
    num_embed, embed_dim = codebook.shape
    assert c == embed_dim, "channel dim must equal embed_dim"
    hw = h * w

    # NCHW-native view: (b, D, h*w).  Pure reshape -- no transpose, no copy.
    z_bdn = z_nchw.reshape(b, embed_dim, hw).astype(jnp.float32)

    # Hoisted out of the grid loop: codebook L2 normalisation (sim dtype).
    cb_f32 = codebook.astype(jnp.float32)
    cb_norm = jnp.sqrt(jnp.sum(cb_f32 * cb_f32, axis=-1, keepdims=True))
    cbn = (cb_f32 / jnp.maximum(cb_norm, 1e-12)).astype(sim_dtype)  # (E, D)

    vmem_limit = _vmem_limit_bytes()
    if tile_hw is None:
        tile_hw = _choose_tile_hw(hw, b, num_embed, embed_dim,
                                  jnp.dtype(sim_dtype).itemsize, vmem_limit)
    assert hw % tile_hw == 0, "h*w must be divisible by tile_hw"
    assert tile_hw == hw or tile_hw % 128 == 0, "tile_hw must be lane aligned"
    nt = hw // tile_hw

    idx_b1n = pl.pallas_call(
        _vq_lookup_kernel,
        out_shape=jax.ShapeDtypeStruct((b, 1, hw), jnp.int32),
        grid_spec=pltpu.PrefetchScalarGridSpec(
            num_scalar_prefetch=0,
            grid=(b, nt),
            in_specs=[
                pl.BlockSpec((1, embed_dim, tile_hw),
                             lambda bi, ti: (bi, 0, ti)),
                # Resident normalised codebook (constant index map).
                pl.BlockSpec((num_embed, embed_dim), lambda bi, ti: (0, 0)),
            ],
            out_specs=pl.BlockSpec((1, 1, tile_hw), lambda bi, ti: (bi, 0, ti)),
        ),
        compiler_params=pltpu.CompilerParams(
            dimension_semantics=("parallel", "parallel"),
            vmem_limit_bytes=int(vmem_limit)),
    )(z_bdn, cbn)

    idx_bn = idx_b1n.reshape(b, hw)
    encoding_indices = idx_bn.reshape(-1)       # row order: b, h, w (as PyTorch)

    # z_q: exact codebook rows via a gather (replaces the one-hot @ codebook
    # matmul), produced directly in the (b, D, hw) layout -- no transpose.
    cb_t = cb_f32.T                                                   # (D, E)
    z_q_bdn = jax.vmap(lambda i: jnp.take(cb_t, i, axis=1))(idx_bn)   # (b, D, hw)

    # loss = beta * mean((z_q.detach() - z)^2) + mean((z_q - z.detach())^2)
    diff = z_q_bdn - z_bdn
    mse = jnp.mean(diff * diff)
    loss = beta * mse + mse

    # Straight-through estimator: forward value of z_q is the quantised z_q.
    z_q_nchw = z_q_bdn.reshape(b, embed_dim, h, w).astype(z_nchw.dtype)

    # Codebook usage stats: exact counts via scatter-add on the indices
    # (no per-tile histogram output, no (N, E) one-hot needed for this).
    counts = jnp.zeros((num_embed,), jnp.float32).at[encoding_indices].add(1.0)
    avg_probs = counts / (b * hw)
    perplexity = jnp.exp(-jnp.sum(avg_probs * jnp.log(avg_probs + 1e-10)))

    if min_encodings_dtype is None:
        min_encodings = None        # optional: skip the (N, E) one-hot entirely
    else:
        min_encodings = jax.nn.one_hot(encoding_indices, num_embed,
                                       dtype=min_encodings_dtype)

    return z_q_nchw, loss, (perplexity, min_encodings, encoding_indices)


if __name__ == "__main__":
    # Module config: num_embed=16 codes, embed_dim=4, beta=0.25, distance='cos'.
    num_embed, embed_dim, beta = 16, 4, 0.25
    b, h, w = 2, 16, 16

    key = jax.random.PRNGKey(0)
    k_z, k_cb = jax.random.split(key)
    z = jax.random.normal(k_z, (b, embed_dim, h, w), dtype=jnp.float32)
    # nn.Embedding init: uniform(-1/num_embed, 1/num_embed)
    codebook = jax.random.uniform(k_cb, (num_embed, embed_dim), jnp.float32,
                                  minval=-1.0 / num_embed,
                                  maxval=1.0 / num_embed)

    runs = {
        # default: bf16 similarity, auto tile (chip-aware)
        "bf16_auto": vector_quantiser_forward(z, codebook, beta=beta),
        # exact f32 similarity, forced multi-tile schedule
        "f32_tiled": vector_quantiser_forward(z, codebook, beta=beta,
                                              tile_hw=128,
                                              sim_dtype=jnp.float32),
    }
    jax.block_until_ready(runs)
    tols = {"bf16_auto": 2.5e-2, "f32_tiled": 5e-3}

    # ---- host-side float64 reference of the eval-mode forward ----
    z_np = np.asarray(z, dtype=np.float64)
    cb_np = np.asarray(codebook, dtype=np.float64)
    n_rows = b * h * w
    z_flat = z_np.transpose(0, 2, 3, 1).reshape(n_rows, embed_dim)  # module order
    zn_ref = z_flat / np.maximum(
        np.linalg.norm(z_flat, axis=1, keepdims=True), 1e-12)
    cbn_ref = cb_np / np.maximum(
        np.linalg.norm(cb_np, axis=1, keepdims=True), 1e-12)
    d_ref = zn_ref @ cbn_ref.T                                       # (N, E)
    best = d_ref.max(axis=1)

    for name, (z_q, loss, (perp, min_enc, idx)) in runs.items():
        tol = tols[name]
        idx_np = np.asarray(idx)
        assert idx_np.shape == (n_rows,), name
        assert idx_np.min() >= 0 and idx_np.max() < num_embed, name

        # Chosen codes are (near-)optimal under the exact cosine similarity.
        chosen = d_ref[np.arange(n_rows), idx_np]
        assert np.all(chosen >= best - tol), name

        # z_q must be the selected codebook rows, laid back out as NCHW.
        zq_ref = cb_np[idx_np].reshape(b, h, w, embed_dim).transpose(0, 3, 1, 2)
        assert z_q.shape == (b, embed_dim, h, w), name
        assert np.allclose(np.asarray(z_q, np.float64), zq_ref,
                           rtol=1e-5, atol=1e-6), name

        # loss / perplexity / one-hot consistent with the selected codes.
        mse_ref = np.mean((cb_np[idx_np] - z_flat) ** 2)
        assert np.isfinite(float(loss)) and np.isfinite(float(perp)), name
        assert np.allclose(float(loss), (1.0 + beta) * mse_ref,
                           rtol=1e-4, atol=1e-7), name
        cnt = np.bincount(idx_np, minlength=num_embed).astype(np.float64)
        avg = cnt / n_rows
        perp_ref = np.exp(-np.sum(avg * np.log(avg + 1e-10)))
        assert np.allclose(float(perp), perp_ref, rtol=1e-4, atol=1e-6), name
        assert min_enc.shape == (n_rows, num_embed), name
        assert np.array_equal(np.asarray(min_enc),
                              np.eye(num_embed, dtype=np.float32)[idx_np]), name

    # The exact (f32) similarity run should reproduce the reference argmax with
    # the PyTorch tie-break (ascending sort, take last == largest index among
    # ties); allow disagreement only on genuine near-ties.
    idx_f32 = np.asarray(runs["f32_tiled"][2][2])
    ref_idx = (num_embed - 1) - np.argmax(d_ref[:, ::-1], axis=1)
    mismatch = idx_f32 != ref_idx
    if np.any(mismatch):
        rows = np.arange(n_rows)[mismatch]
        gaps = best[mismatch] - d_ref[rows, idx_f32[mismatch]]
        assert float(np.max(gaps)) < 5e-3, "f32 run deviates beyond near-ties"

    print("KERNEL_OK")
</pallas_src>

<mosaic_0001>
module attributes {stable_mosaic.version = 11 : i64} {
  func.func private @main(%arg0: i32) attributes {dimension_semantics = [#tpu.dimension_semantics<core_parallel>], iteration_bounds = array<i64: 2>, tpu.core_type = #tpu.core_type<sc_scalar_subcore>, window_params = []} {
    return
  }
}

module attributes {stable_mosaic.version = 11 : i64} {
  func.func private @main(%arg0: i32) attributes {dimension_semantics = [#tpu.dimension_semantics<core_parallel>], iteration_bounds = array<i64: 2>, tpu.core_type = #tpu.core_type<sc_scalar_subcore>, window_params = []} {
    return
  }
}

module attributes {stable_mosaic.version = 11 : i64} {
  func.func @_vq_lookup_kernel(%arg0: i32, %arg1: i32, %arg2: memref<1x4x256xf32, #tpu.memory_space<vmem>>, %arg3: memref<16x4xbf16, #tpu.memory_space<vmem>>, %arg4: memref<1x1x256xi32, #tpu.memory_space<vmem>>) attributes {dimension_semantics = [#tpu.dimension_semantics<parallel>, #tpu.dimension_semantics<parallel>], iteration_bounds = array<i64: 2, 1>, scalar_prefetch = 0 : i64, scratch_operands = 0 : i64, tpu.core_type = #tpu.core_type<tc>, window_params = [{transform_indices = @transform_0, window_bounds = array<i64: 1, 4, 256>}, {pipeline_mode = #tpu.pipeline_mode<synchronous>, transform_indices = @transform_1, window_bounds = array<i64: 16, 4>}, {transform_indices = @transform_2, window_bounds = array<i64: 1, 1, 256>}]} {
    %c0 = arith.constant 0 : index
    %c0_0 = arith.constant 0 : index
    %c0_1 = arith.constant 0 : index
    %0 = vector.load %arg2[%c0, %c0_0, %c0_1] : memref<1x4x256xf32, #tpu.memory_space<vmem>>, vector<1x4x256xf32>
    %1 = vector.shape_cast %0 : vector<1x4x256xf32> to vector<4x256xf32>
    %2 = arith.mulf %1, %1 : vector<4x256xf32>
    %cst = arith.constant dense<0.000000e+00> : vector<256xf32>
    %3 = vector.multi_reduction <add>, %2, %cst [0] : vector<4x256xf32> to vector<256xf32>
    %4 = vector.shape_cast %3 : vector<256xf32> to vector<1x256xf32>
    %cst_2 = arith.constant 1.000000e-24 : f32
    %5 = vector.broadcast %cst_2 : f32 to vector<1x256xf32>
    %6 = arith.maximumf %4, %5 : vector<1x256xf32>
    %7 = math.rsqrt %6 : vector<1x256xf32>
    %8 = vector.broadcast %7 : vector<1x256xf32> to vector<4x256xf32>
    %9 = arith.mulf %1, %8 : vector<4x256xf32>
    %c0_3 = arith.constant 0 : index
    %c0_4 = arith.constant 0 : index
    %10 = vector.load %arg3[%c0_3, %c0_4] : memref<16x4xbf16, #tpu.memory_space<vmem>>, vector<16x4xbf16>
    %11 = arith.truncf %9 : vector<4x256xf32> to vector<4x256xbf16>
    %cst_5 = arith.constant dense<0.000000e+00> : vector<16x256xf32>
    %12 = tpu.matmul %10, %11, %cst_5 {dimension_numbers = #tpu.dot_dimension_numbers<[1], [0], [0], [1], [0, 0, 1, 1], [], []>} : vector<16x4xbf16>, vector<4x256xbf16>, vector<16x256xf32> -> vector<16x256xf32>
    %13 = tpu.iota {dimensions = array<i32: 0>} : vector<16x256xi32>
    %cst_6 = arith.constant dense<0xFF800000> : vector<256xf32>
    %14 = vector.multi_reduction <maximumf>, %12, %cst_6 [0] : vector<16x256xf32> to vector<256xf32>
    %15 = vector.shape_cast %14 : vector<256xf32> to vector<1x256xf32>
    %16 = vector.broadcast %15 : vector<1x256xf32> to vector<16x256xf32>
    %17 = arith.cmpf oeq, %12, %16 : vector<16x256xf32>
    %c-1_i32 = arith.constant -1 : i32
    %18 = vector.broadcast %c-1_i32 : i32 to vector<16x256xi32>
    %19 = arith.select %17, %13, %18 : vector<16x256xi1>, vector<16x256xi32>
    %cst_7 = arith.constant dense<-2147483648> : vector<256xi32>
    %20 = vector.multi_reduction <maxsi>, %19, %cst_7 [0] : vector<16x256xi32> to vector<256xi32>
    %21 = vector.shape_cast %20 : vector<256xi32> to vector<1x1x256xi32>
    %c0_8 = arith.constant 0 : index
    %c0_9 = arith.constant 0 : index
    %c0_10 = arith.constant 0 : index
    %22 = vector.load %arg4[%c0_8, %c0_9, %c0_10] : memref<1x1x256xi32, #tpu.memory_space<vmem>>, vector<1x1x256xi32>
    tpu.vector_store %arg4[%c0_8, %c0_9, %c0_10], %21 {strides = array<i32>} : memref<1x1x256xi32, #tpu.memory_space<vmem>>, vector<1x1x256xi32>,
    return
  }
  func.func @transform_0(%arg0: i32, %arg1: i32) -> (i32, i32, i32) {
    %c0_i32 = arith.constant 0 : i32
    %c0_i32_0 = arith.constant 0 : i32
    return %arg0, %c0_i32, %arg1 : i32, i32, i32
  }
  func.func @transform_1(%arg0: i32, %arg1: i32) -> (i32, i32) {
    %c0_i32 = arith.constant 0 : i32
    %c0_i32_0 = arith.constant 0 : i32
    %c0_i32_1 = arith.constant 0 : i32
    return %c0_i32, %c0_i32_0 : i32, i32
  }
  func.func @transform_2(%arg0: i32, %arg1: i32) -> (i32, i32, i32) {
    %c0_i32 = arith.constant 0 : i32
    %c0_i32_0 = arith.constant 0 : i32
    return %arg0, %c0_i32, %arg1 : i32, i32, i32
  }
}

</mosaic_0001>

<bundles_post_ra>
// kernel: vector_quantiser_forward.1
= control target key start
LH: loop header
LB: loop body
LE: loop exit
PB: predicated region body
PF: predicated region fallthrough
CT: control target
= control target key end

     0   :  { %s511_s9 = smov 0   ;;  %s513_s10 = smov 0   ;;  %s551_s0 = inlined_call_operand.vmem [shape: f32[2,4,256], index: 0, kind: input, shape index: {}]   ;;  %s552_s1 = inlined_call_operand.vmem [shape: bf16[16,4], index: 1, kind: input, shape index: {}]   ;;  %s553_s2 = inlined_call_operand.vmem [shape: s32[2,1,256], index: 2, kind: output, shape index: {}]  }
   0x1   :  { %s515_s11 = smov 0  }
   0x2 LB: > { %s24_s12 = sadd.s32 1, %s488_s10  ;;  %p429_p0 = scmp.ge.s32.totalorder %s492_s11, 1  ;;  %s492_s11 = sphi %s515_s11, %s12_s11   ;;  %s488_s10 = sphi %s513_s10, %s555_s10   ;;  %s484_s9 = sphi %s511_s9, %s554_s9  }
   0x3   : > { %p26_p1 = scmp.ge.s32.totalorder %s24_s12, 2  ;;  %p133_p2 = scmp.lt.s32.totalorder %s492_s11, 3 }
   0x5   : > { %s557_s12 = smov (%p26_p1, %s24_s12), 0  ;;  %p134_p3 = pnand %p429_p0, %p133_p2 }
   0x6   : > { %p163_p4 = scmp.lt.s32.totalorder (!%p134_p3), %s484_s9, 1  ;;  %v494_v0 = vmov (!%p134_p3), 0   ;;  %vm187_vm0 = vcmask (!%p134_p3), 1043456   ;;  %vm227_vm1 = vcmask (!%p134_p3), 1041408   ;;  %v465_v28 = vld [vmem:[%s552_s1] sm:$0xff] (!%p134_p3)   ;;  %vm223_vm2 = vcmask (!%p134_p3), 31744  }
   0x7   : > { %137 = sbr.rel (%p134_p3) target bundleno = 312 (0x138), region = 28  ;;  %266 = vmatprep.mubr.bf16.mxu0 (!%p134_p3), %v494_v0  ;;  %v277_v36 = vlaneseq (!%p134_p3)  ;;  %v495_v59 = vmov (!%p134_p3), 1966171168  }
   0x8   : > { %v326_v60 = vunpack.c.l.s4 (!%p134_p3), %v495_v59 }
   0x9   : > { %v278_v41 = vshrl.u32 (!%p134_p3), %v277_v36, 7  ;;  %vm341_vm15 = vcmp.lt.s32.totalorder (!%p134_p3), %v277_v36, 256 }
   0xb   : > { %v279_v46 = vadd.s32 (!%p134_p3), 8, %v278_v41 }
   0xe   : > { %s559_s9 = smov (!%p163_p4, %s484_s9), 1 }
   0xf   : > { %s438_s13 = sshll.u32 %s559_s9, 3  ;;  %s432_s19 = sshll.u32 %s559_s9, 1 }
  0x10   : > { %s170_s16 = scalar_lea.vmem %s551_s0, %s438_s13  ;;  %s179_s22 = scalar_lea.vmem %s553_s2, %s432_s19 }
  0x11   : > { %v182_v1 = vld [vmem:[%s170_s16] sm:$0xff] }
  0x12   : > { %v183_v2 = vmul.f32 %v182_v1, %v182_v1 }
  0x14   : > { %v185_v3 = vcombine.high %v183_v2, %v183_v2  ;;  %v188_v4 = vsel %vm187_vm0, %v183_v2, 0.0 }
  0x15   : > { %v189_v5 = vrot.slane %v188_v4, 4 }
  0x16   : > { %v195_v6 = vsel %vm187_vm0, %v185_v3, 0.0 }
  0x17   : > { %v190_v7 = vadd.f32 %v189_v5, %v188_v4  ;;  %v196_v8 = vrot.slane %v195_v6, 4 }
  0x19   : > { %v191_v9 = vrot.slane %v190_v7, 2  ;;  %v197_v10 = vadd.f32 %v196_v8, %v195_v6 }
  0x1b   : > { %v192_v11 = vadd.f32 %v191_v9, %v190_v7  ;;  %v198_v12 = vrot.slane %v197_v10, 2 }
  0x1d   : > { %v193_v13 = vrot.slane %v192_v11, 1  ;;  %v199_v14 = vadd.f32 %v198_v12, %v197_v10 }
  0x1f   : > { %v194_v15 = vadd.f32 %v193_v13, %v192_v11  ;;  %v200_v16 = vrot.slane %v199_v14, 1 }
  0x21   : > { %v201_v17 = vadd.f32 %v200_v16, %v199_v14  ;;  %v202_v18 = vmax.f32 %v194_v15, 1e-24 }
  0x23   : > { %v203_v19 = vmax.f32 %v201_v17, 1e-24  ;;  %466 = vrsqrt.f32 %v202_v18 }
  0x25   : > { %468 = vrsqrt.f32 %v203_v19 }
  0x2d   : > { %v467_v20 = vpop.eup %466 }
  0x2f   : > { %v469_v21 = vpop.eup %468 }
  0x30   : > { %v208_v22 = vcombine.low %v467_v20, %v469_v21 }
  0x32   : > { %v210_v23 = vmul.f32 %v208_v22, %v182_v1  ;;  %v327_v1 = vunpack.c.0.s8 %v326_v60 }
  0x34   : > { %v214_v24 = vcombine.high %v210_v23, %v210_v23  ;;  %v216_v25 = vpack.c.bf16 %v210_v23, %v210_v23  ;;  %v330_v6 = vsub.s32 %v327_v1, %v278_v41 }
  0x36   : > { %v217_v26 = vpack.c.bf16 %v214_v24, %v214_v24  ;;  %v229_v27 = vsel %vm227_vm1, %v216_v25, 0 }
  0x38   : > { %434 = vmatprep.subr.msk.bf16.mxu0 %vm227_vm1, %v217_v26 }
  0x39   : > { %235 = vmatpush1.bf16.msra.mxu0 %v229_v27 }
  0x3c   : > { %435 = vmatmul.mubr.msk.bf16.vlgmr.msra.gmra.mrb[0].mxu0 %vm223_vm2, %v465_v28 }
 0x10f   : > { %v268_v29 = vpop.f32.mrb[0].mxu0 }
 0x110   : > { %v270_v30 = vpop.f32.mrb[1].mxu0 }
 0x111   : > { %v272_v31 = vpop.f32.mrb[2].mxu0 }
 0x112   : > { %v280_v32 = vmax.f32 %v268_v29, %v272_v31  ;;  %v274_v33 = vpop.f32.mrb[3].mxu0 }
 0x113   : > { %v287_v34 = vmax.f32 %v270_v30, %v274_v33 }
 0x114   : > { %v281_v35 = vrot.slane %v280_v32, 4 }
 0x115   : > { %v288_v37 = vrot.slane %v287_v34, 4 }
 0x116   : > { %v282_v38 = vmax.f32 %v280_v32, %v281_v35 }
 0x117   : > { %v289_v39 = vmax.f32 %v287_v34, %v288_v37 }
 0x118   : > { %v283_v40 = vrot.slane %v282_v38, 2 }
 0x119   : > { %v290_v42 = vrot.slane %v289_v39, 2 }
 0x11a   : > { %v284_v43 = vmax.f32 %v282_v38, %v283_v40 }
 0x11b   : > { %v291_v44 = vmax.f32 %v289_v39, %v290_v42 }
 0x11c   : > { %v285_v45 = vrot.slane %v284_v43, 1 }
 0x11d   : > { %v292_v47 = vrot.slane %v291_v44, 1 }
 0x11e   : > { %v286_v48 = vmax.f32 %v284_v43, %v285_v45 }
 0x11f   : > { %v293_v49 = vmax.f32 %v291_v44, %v292_v47 }
 0x120   : > { %vm294_vm3 = vcmp.eq.f32.partialorder %v268_v29, %v286_v48  ;;  %vm296_vm4 = vcmp.eq.f32.partialorder %v272_v31, %v286_v48 }
 0x121   : > { %v298_v50 = vsel %vm294_vm3, %v278_v41, 4294967295  ;;  %v300_v51 = vsel %vm296_vm4, %v279_v46, 4294967295  ;;  %vm295_vm5 = vcmp.eq.f32.partialorder %v270_v30, %v293_v49  ;;  %vm297_vm6 = vcmp.eq.f32.partialorder %v274_v33, %v293_v49 }
 0x122   : > { %vm302_vm7 = vcmp.gt.s32.totalorder %v298_v50, %v300_v51  ;;  %v299_v52 = vsel %vm295_vm5, %v278_v41, 4294967295  ;;  %v301_v53 = vsel %vm297_vm6, %v279_v46, 4294967295 }
 0x123   : > { %v303_v54 = vsel %vm302_vm7, %v298_v50, %v300_v51  ;;  %vm313_vm8 = vcmp.gt.s32.totalorder %v299_v52, %v301_v53 }
 0x124   : > { %v304_v55 = vrot.slane %v303_v54, 4  ;;  %v314_v56 = vsel %vm313_vm8, %v299_v52, %v301_v53 }
 0x125   : > { %v315_v57 = vrot.slane %v314_v56, 4 }
 0x126   : > { %vm305_vm9 = vcmp.gt.s32.totalorder %v303_v54, %v304_v55 }
 0x127   : > { %v306_v58 = vsel %vm305_vm9, %v303_v54, %v304_v55  ;;  %vm316_vm10 = vcmp.gt.s32.totalorder %v314_v56, %v315_v57 }
 0x128   : > { %v307_v61 = vrot.slane %v306_v58, 2  ;;  %v317_v62 = vsel %vm316_vm10, %v314_v56, %v315_v57 }
 0x129   : > { %v318_v63 = vrot.slane %v317_v62, 2 }
 0x12a   : > { %vm308_vm11 = vcmp.gt.s32.totalorder %v306_v58, %v307_v61 }
 0x12b   : > { %v309_v0 = vsel %vm308_vm11, %v306_v58, %v307_v61  ;;  %vm319_vm12 = vcmp.gt.s32.totalorder %v317_v62, %v318_v63 }
 0x12c   : > { %v310_v2 = vrot.slane %v309_v0, 1  ;;  %v320_v3 = vsel %vm319_vm12, %v317_v62, %v318_v63 }
 0x12d   : > { %v321_v4 = vrot.slane %v320_v3, 1 }
 0x12e   : > { %vm311_vm13 = vcmp.gt.s32.totalorder %v309_v0, %v310_v2 }
 0x12f   : > { %v312_v5 = vsel %vm311_vm13, %v309_v0, %v310_v2  ;;  %vm322_vm14 = vcmp.gt.s32.totalorder %v320_v3, %v321_v4 }
 0x130   : > { %v323_v7 = vsel %vm322_vm14, %v320_v3, %v321_v4 }
 0x131   : > { %v324_v8 = vcombine.low %v312_v5, %v323_v7 }
 0x133   : > { %v331_v9 = vrot.slane %v324_v8, %v330_v6 }
 0x135   : > { %v338_v10 = vrot.slane %v331_v9, %v330_v6 }
 0x137   : > { %343 = vst.msk [vmem:[%s179_s22] sm:$0x3] %vm341_vm15, %v338_v10 }
 0x138 PF: > { %s12_s11 = sadd.s32 1, %s492_s11   ;;  %s554_s9 = smov %s488_s10 }
 0x139   : > { %p9_p5 = scmp.ge.s32.totalorder %s12_s11, 4   ;;  %s555_s10 = smov %s557_s12 }
 0x13b   :  { %11 = sbr.rel (!%p9_p5) target bundleno = 2 (0x2), region = 58 }

</bundles_post_ra>
